<compile_context>
chip_gen: v7x
topology: tpu7x:2x2x1
jax: 0.10.0
libtpu: 0.0.40
codegen_flags: <defaults>
</compile_context>

<pallas_src>
import functools

import jax
import jax.numpy as jnp
from jax.experimental import pallas as pl
from jax.experimental.pallas import tpu as pltpu

NEG_SLOPE = 0.01   # nn.LeakyReLU default negative_slope
BN_EPS = 1e-5      # nn.BatchNorm1d default eps
LANE = 128
SUBLANE = 8


def _leaky_relu(x):
    return jnp.where(x >= 0, x, NEG_SLOPE * x)


def _round_up(n, m):
    return ((n + m - 1) // m) * m


def encoder_kernel(x_ref,
                   w_rna_ref, w_pro_ref, w_enc_rna_ref, w_enc_pro_ref,
                   s_rna_ref, b_rna_ref, s_pro_ref, b_pro_ref,
                   s_enc_ref, b_enc_ref,
                   o_ref, *, nr_pad):
    # In-kernel feature split at a 128-lane-aligned boundary (free ref slicing;
    # avoids a separate HBM pass over x in the wrapper).
    x_rna = x_ref[:, :nr_pad]
    x_pro = x_ref[:, nr_pad:]

    # Hoisted BN scale/shift loads (loop-invariant across the batch grid).
    s_rna, b_rna = s_rna_ref[...], b_rna_ref[...]
    s_pro, b_pro = s_pro_ref[...], b_pro_ref[...]
    s_enc, b_enc = s_enc_ref[...], b_enc_ref[...]

    # RNA branch: Linear(no bias) -> LeakyReLU -> BatchNorm1d(eval) -> Dropout(id)
    h_rna = jnp.dot(x_rna, w_rna_ref[...], preferred_element_type=jnp.float32)
    h_rna = _leaky_relu(h_rna) * s_rna + b_rna

    # Protein branch
    h_pro = jnp.dot(x_pro, w_pro_ref[...], preferred_element_type=jnp.float32)
    h_pro = _leaky_relu(h_pro) * s_pro + b_pro

    # Head: Linear over concat([h_rna, h_pro], 1) realised as a split matmul
    # (no lane-axis concatenate needed; padded hidden lanes are exactly zero
    # and their w_enc rows are zero, so padding never contaminates real lanes).
    z = (jnp.dot(h_rna.astype(w_enc_rna_ref.dtype), w_enc_rna_ref[...],
                 preferred_element_type=jnp.float32)
         + jnp.dot(h_pro.astype(w_enc_pro_ref.dtype), w_enc_pro_ref[...],
                   preferred_element_type=jnp.float32))
    z = _leaky_relu(z) * s_enc + b_enc
    o_ref[...] = z.astype(o_ref.dtype)


def _fold_bn(gamma, beta, mean, var, n_pad):
    """Fold eval-mode BatchNorm1d into (1, n_pad) f32 scale/shift; pad shift=0."""
    scale = gamma / jnp.sqrt(var + BN_EPS)
    shift = beta - mean * scale
    scale = jnp.pad(scale, (0, n_pad - scale.shape[0]), constant_values=1.0)
    shift = jnp.pad(shift, (0, n_pad - shift.shape[0]))  # pad lanes -> output 0
    return scale[None, :].astype(jnp.float32), shift[None, :].astype(jnp.float32)


def _pad2d(a, rows, cols, dtype):
    a = jnp.pad(a, ((0, rows - a.shape[0]), (0, cols - a.shape[1])))
    return a.astype(dtype)


def encoder_forward(x, params, nfeatures_rna, nfeatures_pro,
                    *, batch_tile=256, compute_dtype=jnp.bfloat16):
    """Pallas forward for the nfeatures_rna > 0 and nfeatures_pro > 0 branch."""
    # TODO(synk): single-modality branches (nfeatures_rna==0 or nfeatures_pro==0)
    # of Encoder.forward are not wired here; only the dual-modality path is used.
    assert nfeatures_rna > 0 and nfeatures_pro > 0
    B = x.shape[0]
    nr, npro = nfeatures_rna, nfeatures_pro
    hr = params["w_rna"].shape[1]
    hp = params["w_pro"].shape[1]
    zd = params["w_enc"].shape[1]

    # Lane/sublane-aligned (padded) problem sizes.
    nr_p, np_p = _round_up(nr, LANE), _round_up(npro, LANE)
    hr_p, hp_p = _round_up(hr, LANE), _round_up(hp, LANE)
    zd_p = _round_up(zd, LANE)
    b8 = _round_up(B, SUBLANE)
    tb = b8 if b8 <= batch_tile else batch_tile
    b_p = _round_up(b8, tb)
    grid = (b_p // tb,)

    # Lay x out once so the RNA/protein split falls on a 128-lane boundary.
    # TODO(synk): in a real pipeline, store x pre-padded to skip this copy.
    x_p = jnp.zeros((b_p, nr_p + np_p), compute_dtype)
    x_p = x_p.at[:B, :nr].set(x[:, :nr].astype(compute_dtype))
    x_p = x_p.at[:B, nr_p:nr_p + npro].set(x[:, nr:].astype(compute_dtype))

    # Zero-padded bf16 weights ([in, out] layout; zero padding keeps math exact).
    w_rna = _pad2d(params["w_rna"], nr_p, hr_p, compute_dtype)
    w_pro = _pad2d(params["w_pro"], np_p, hp_p, compute_dtype)
    w_enc_rna = _pad2d(params["w_enc"][:hr, :], hr_p, zd_p, compute_dtype)
    w_enc_pro = _pad2d(params["w_enc"][hr:, :], hp_p, zd_p, compute_dtype)

    # Eval-mode BatchNorm1d folded to f32 scale/shift (pad lanes -> 0 output).
    s_rna, b_rna = _fold_bn(*params["bn_rna"], hr_p)
    s_pro, b_pro = _fold_bn(*params["bn_pro"], hp_p)
    s_enc, b_enc = _fold_bn(*params["bn_enc"], zd_p)

    def tile_spec(cols):
        return pl.BlockSpec((tb, cols), lambda i: (i, 0))

    def const_spec(shape):
        return pl.BlockSpec(shape, lambda i: (0, 0))

    inputs = (x_p,
              w_rna, w_pro, w_enc_rna, w_enc_pro,
              s_rna, b_rna, s_pro, b_pro, s_enc, b_enc)
    in_specs = [tile_spec(nr_p + np_p)] + [const_spec(a.shape) for a in inputs[1:]]

    flops = 2 * b_p * (nr_p * hr_p + np_p * hp_p + (hr_p + hp_p) * zd_p)
    bytes_accessed = (sum(int(a.size) * a.dtype.itemsize for a in inputs)
                      + b_p * zd_p * 4)
    cost = pl.CostEstimate(flops=int(flops), transcendentals=0,
                           bytes_accessed=int(bytes_accessed))

    # VMEM budget: resident weights/BN + double-buffered x tile + output tile.
    resident = sum(int(a.size) * a.dtype.itemsize for a in inputs[1:])
    est = (resident
           + 2 * tb * (nr_p + np_p) * jnp.dtype(compute_dtype).itemsize
           + 2 * tb * zd_p * 4)
    vmem_limit = int(min(64 << 20, max(16 << 20, 2 * est)))
    # TODO(synk): for very large nfeatures_rna (>~8k genes) on v7x (64 MiB VMEM),
    # add a K-reduction grid axis with a VMEM f32 accumulator instead of keeping
    # the full w_rna resident.

    out = pl.pallas_call(
        functools.partial(encoder_kernel, nr_pad=nr_p),
        out_shape=jax.ShapeDtypeStruct((b_p, zd_p), jnp.float32),
        grid=grid,
        in_specs=in_specs,
        out_specs=tile_spec(zd_p),
        compiler_params=pltpu.CompilerParams(
            dimension_semantics=("parallel",),   # megacore split over batch tiles (v7x)
            vmem_limit_bytes=vmem_limit),
        cost_estimate=cost,
    )(*inputs)
    return out[:B, :zd]


def encoder_reference(x, params, nfeatures_rna):
    """Pure-JAX f32 reference for correctness checking."""
    def bn(h, stats):
        g, b, m, v = stats
        return (h - m) / jnp.sqrt(v + BN_EPS) * g + b

    h_rna = bn(_leaky_relu(x[:, :nfeatures_rna] @ params["w_rna"]), params["bn_rna"])
    h_pro = bn(_leaky_relu(x[:, nfeatures_rna:] @ params["w_pro"]), params["bn_pro"])
    h = jnp.concatenate([h_rna, h_pro], axis=1)
    return bn(_leaky_relu(h @ params["w_enc"]), params["bn_enc"])


if __name__ == "__main__":
    B = 8
    NFEAT_RNA, NFEAT_PRO = 16, 8
    HIDDEN_RNA, HIDDEN_PRO, Z_DIM = 32, 16, 8

    key = jax.random.PRNGKey(0)
    ks = jax.random.split(key, 16)

    x = jax.random.normal(ks[0], (B, NFEAT_RNA + NFEAT_PRO), jnp.float32)

    def make_bn(k, n):
        k1, k2, k3, k4 = jax.random.split(k, 4)
        gamma = 1.0 + 0.1 * jax.random.normal(k1, (n,), jnp.float32)
        beta = 0.1 * jax.random.normal(k2, (n,), jnp.float32)
        running_mean = 0.1 * jax.random.normal(k3, (n,), jnp.float32)
        running_var = 0.5 + jnp.abs(jax.random.normal(k4, (n,), jnp.float32))
        return (gamma, beta, running_mean, running_var)

    params = {
        # weights stored as [in_features, out_features] (transposed vs torch nn.Linear)
        "w_rna": 0.1 * jax.random.normal(ks[1], (NFEAT_RNA, HIDDEN_RNA), jnp.float32),
        "w_pro": 0.1 * jax.random.normal(ks[2], (NFEAT_PRO, HIDDEN_PRO), jnp.float32),
        "w_enc": 0.1 * jax.random.normal(ks[3], (HIDDEN_RNA + HIDDEN_PRO, Z_DIM), jnp.float32),
        "bn_rna": make_bn(ks[4], HIDDEN_RNA),
        "bn_pro": make_bn(ks[5], HIDDEN_PRO),
        "bn_enc": make_bn(ks[6], Z_DIM),
    }

    out = encoder_forward(x, params, NFEAT_RNA, NFEAT_PRO)
    out = jax.block_until_ready(out)

    ref = encoder_reference(x, params, NFEAT_RNA)
    assert out.shape == (B, Z_DIM)
    # bf16 inputs/weights (f32 accumulation) -> compare against f32 reference
    # with a tolerance matching the bf16 quantization level.
    assert jnp.allclose(out, ref, atol=2e-2, rtol=2e-2), "mismatch vs reference"

    print("KERNEL_OK")
</pallas_src>

<mosaic_0001>
module attributes {stable_mosaic.version = 11 : i64} {
  func.func @encoder_kernel(%arg0: i32, %arg1: memref<8x256xbf16, #tpu.memory_space<vmem>>, %arg2: memref<128x128xbf16, #tpu.memory_space<vmem>>, %arg3: memref<128x128xbf16, #tpu.memory_space<vmem>>, %arg4: memref<128x128xbf16, #tpu.memory_space<vmem>>, %arg5: memref<128x128xbf16, #tpu.memory_space<vmem>>, %arg6: memref<1x128xf32, #tpu.memory_space<vmem>>, %arg7: memref<1x128xf32, #tpu.memory_space<vmem>>, %arg8: memref<1x128xf32, #tpu.memory_space<vmem>>, %arg9: memref<1x128xf32, #tpu.memory_space<vmem>>, %arg10: memref<1x128xf32, #tpu.memory_space<vmem>>, %arg11: memref<1x128xf32, #tpu.memory_space<vmem>>, %arg12: memref<8x128xf32, #tpu.memory_space<vmem>>) attributes {dimension_semantics = [#tpu.dimension_semantics<parallel>], iteration_bounds = array<i64: 1>, scalar_prefetch = 0 : i64, scratch_operands = 0 : i64, tpu.core_type = #tpu.core_type<tc>, window_params = [{transform_indices = @transform_0, window_bounds = array<i64: 8, 256>}, {pipeline_mode = #tpu.pipeline_mode<synchronous>, transform_indices = @transform_1, window_bounds = array<i64: 128, 128>}, {pipeline_mode = #tpu.pipeline_mode<synchronous>, transform_indices = @transform_2, window_bounds = array<i64: 128, 128>}, {pipeline_mode = #tpu.pipeline_mode<synchronous>, transform_indices = @transform_3, window_bounds = array<i64: 128, 128>}, {pipeline_mode = #tpu.pipeline_mode<synchronous>, transform_indices = @transform_4, window_bounds = array<i64: 128, 128>}, {pipeline_mode = #tpu.pipeline_mode<synchronous>, transform_indices = @transform_5, window_bounds = array<i64: 1, 128>}, {pipeline_mode = #tpu.pipeline_mode<synchronous>, transform_indices = @transform_6, window_bounds = array<i64: 1, 128>}, {pipeline_mode = #tpu.pipeline_mode<synchronous>, transform_indices = @transform_7, window_bounds = array<i64: 1, 128>}, {pipeline_mode = #tpu.pipeline_mode<synchronous>, transform_indices = @transform_8, window_bounds = array<i64: 1, 128>}, {pipeline_mode = #tpu.pipeline_mode<synchronous>, transform_indices = @transform_9, window_bounds = array<i64: 1, 128>}, {pipeline_mode = #tpu.pipeline_mode<synchronous>, transform_indices = @transform_10, window_bounds = array<i64: 1, 128>}, {transform_indices = @transform_11, window_bounds = array<i64: 8, 128>}]} {
    %c0 = arith.constant 0 : index
    %c0_0 = arith.constant 0 : index
    %0 = vector.load %arg1[%c0, %c0_0] : memref<8x256xbf16, #tpu.memory_space<vmem>>, vector<8x128xbf16>
    %c0_1 = arith.constant 0 : index
    %c128 = arith.constant 128 : index
    %1 = vector.load %arg1[%c0_1, %c128] : memref<8x256xbf16, #tpu.memory_space<vmem>>, vector<8x128xbf16>
    %c0_2 = arith.constant 0 : index
    %c0_3 = arith.constant 0 : index
    %2 = vector.load %arg6[%c0_2, %c0_3] : memref<1x128xf32, #tpu.memory_space<vmem>>, vector<1x128xf32>
    %c0_4 = arith.constant 0 : index
    %c0_5 = arith.constant 0 : index
    %3 = vector.load %arg7[%c0_4, %c0_5] : memref<1x128xf32, #tpu.memory_space<vmem>>, vector<1x128xf32>
    %c0_6 = arith.constant 0 : index
    %c0_7 = arith.constant 0 : index
    %4 = vector.load %arg8[%c0_6, %c0_7] : memref<1x128xf32, #tpu.memory_space<vmem>>, vector<1x128xf32>
    %c0_8 = arith.constant 0 : index
    %c0_9 = arith.constant 0 : index
    %5 = vector.load %arg9[%c0_8, %c0_9] : memref<1x128xf32, #tpu.memory_space<vmem>>, vector<1x128xf32>
    %c0_10 = arith.constant 0 : index
    %c0_11 = arith.constant 0 : index
    %6 = vector.load %arg10[%c0_10, %c0_11] : memref<1x128xf32, #tpu.memory_space<vmem>>, vector<1x128xf32>
    %c0_12 = arith.constant 0 : index
    %c0_13 = arith.constant 0 : index
    %7 = vector.load %arg11[%c0_12, %c0_13] : memref<1x128xf32, #tpu.memory_space<vmem>>, vector<1x128xf32>
    %c0_14 = arith.constant 0 : index
    %c0_15 = arith.constant 0 : index
    %8 = vector.load %arg2[%c0_14, %c0_15] : memref<128x128xbf16, #tpu.memory_space<vmem>>, vector<128x128xbf16>
    %cst = arith.constant dense<0.000000e+00> : vector<8x128xf32>
    %9 = tpu.matmul %0, %8, %cst {dimension_numbers = #tpu.dot_dimension_numbers<[1], [0], [0], [1], [0, 0, 1, 1], [], []>} : vector<8x128xbf16>, vector<128x128xbf16>, vector<8x128xf32> -> vector<8x128xf32>
    %cst_16 = arith.constant 0.000000e+00 : f32
    %10 = vector.broadcast %cst_16 : f32 to vector<8x128xf32>
    %11 = arith.cmpf oge, %9, %10 : vector<8x128xf32>
    %cst_17 = arith.constant 0.00999999977 : f32
    %12 = vector.broadcast %cst_17 : f32 to vector<8x128xf32>
    %13 = arith.mulf %12, %9 : vector<8x128xf32>
    %14 = arith.select %11, %9, %13 : vector<8x128xi1>, vector<8x128xf32>
    %15 = vector.broadcast %2 : vector<1x128xf32> to vector<8x128xf32>
    %16 = arith.mulf %14, %15 : vector<8x128xf32>
    %17 = vector.broadcast %3 : vector<1x128xf32> to vector<8x128xf32>
    %18 = arith.addf %16, %17 : vector<8x128xf32>
    %c0_18 = arith.constant 0 : index
    %c0_19 = arith.constant 0 : index
    %19 = vector.load %arg3[%c0_18, %c0_19] : memref<128x128xbf16, #tpu.memory_space<vmem>>, vector<128x128xbf16>
    %cst_20 = arith.constant dense<0.000000e+00> : vector<8x128xf32>
    %20 = tpu.matmul %1, %19, %cst_20 {dimension_numbers = #tpu.dot_dimension_numbers<[1], [0], [0], [1], [0, 0, 1, 1], [], []>} : vector<8x128xbf16>, vector<128x128xbf16>, vector<8x128xf32> -> vector<8x128xf32>
    %cst_21 = arith.constant 0.000000e+00 : f32
    %21 = vector.broadcast %cst_21 : f32 to vector<8x128xf32>
    %22 = arith.cmpf oge, %20, %21 : vector<8x128xf32>
    %cst_22 = arith.constant 0.00999999977 : f32
    %23 = vector.broadcast %cst_22 : f32 to vector<8x128xf32>
    %24 = arith.mulf %23, %20 : vector<8x128xf32>
    %25 = arith.select %22, %20, %24 : vector<8x128xi1>, vector<8x128xf32>
    %26 = vector.broadcast %4 : vector<1x128xf32> to vector<8x128xf32>
    %27 = arith.mulf %25, %26 : vector<8x128xf32>
    %28 = vector.broadcast %5 : vector<1x128xf32> to vector<8x128xf32>
    %29 = arith.addf %27, %28 : vector<8x128xf32>
    %30 = arith.truncf %18 : vector<8x128xf32> to vector<8x128xbf16>
    %c0_23 = arith.constant 0 : index
    %c0_24 = arith.constant 0 : index
    %31 = vector.load %arg4[%c0_23, %c0_24] : memref<128x128xbf16, #tpu.memory_space<vmem>>, vector<128x128xbf16>
    %cst_25 = arith.constant dense<0.000000e+00> : vector<8x128xf32>
    %32 = tpu.matmul %30, %31, %cst_25 {dimension_numbers = #tpu.dot_dimension_numbers<[1], [0], [0], [1], [0, 0, 1, 1], [], []>} : vector<8x128xbf16>, vector<128x128xbf16>, vector<8x128xf32> -> vector<8x128xf32>
    %33 = arith.truncf %29 : vector<8x128xf32> to vector<8x128xbf16>
    %c0_26 = arith.constant 0 : index
    %c0_27 = arith.constant 0 : index
    %34 = vector.load %arg5[%c0_26, %c0_27] : memref<128x128xbf16, #tpu.memory_space<vmem>>, vector<128x128xbf16>
    %cst_28 = arith.constant dense<0.000000e+00> : vector<8x128xf32>
    %35 = tpu.matmul %33, %34, %cst_28 {dimension_numbers = #tpu.dot_dimension_numbers<[1], [0], [0], [1], [0, 0, 1, 1], [], []>} : vector<8x128xbf16>, vector<128x128xbf16>, vector<8x128xf32> -> vector<8x128xf32>
    %36 = arith.addf %32, %35 : vector<8x128xf32>
    %cst_29 = arith.constant 0.000000e+00 : f32
    %37 = vector.broadcast %cst_29 : f32 to vector<8x128xf32>
    %38 = arith.cmpf oge, %36, %37 : vector<8x128xf32>
    %cst_30 = arith.constant 0.00999999977 : f32
    %39 = vector.broadcast %cst_30 : f32 to vector<8x128xf32>
    %40 = arith.mulf %39, %36 : vector<8x128xf32>
    %41 = arith.select %38, %36, %40 : vector<8x128xi1>, vector<8x128xf32>
    %42 = vector.broadcast %6 : vector<1x128xf32> to vector<8x128xf32>
    %43 = arith.mulf %41, %42 : vector<8x128xf32>
    %44 = vector.broadcast %7 : vector<1x128xf32> to vector<8x128xf32>
    %45 = arith.addf %43, %44 : vector<8x128xf32>
    %c0_31 = arith.constant 0 : index
    %c0_32 = arith.constant 0 : index
    %46 = vector.load %arg12[%c0_31, %c0_32] : memref<8x128xf32, #tpu.memory_space<vmem>>, vector<8x128xf32>
    tpu.vector_store %arg12[%c0_31, %c0_32], %45 {strides = array<i32>} : memref<8x128xf32, #tpu.memory_space<vmem>>, vector<8x128xf32>,
    return
  }
  func.func @transform_0(%arg0: i32) -> (i32, i32) {
    %c0_i32 = arith.constant 0 : i32
    %c0_i32_0 = arith.constant 0 : i32
    return %arg0, %c0_i32 : i32, i32
  }
  func.func @transform_1(%arg0: i32) -> (i32, i32) {
    %c0_i32 = arith.constant 0 : i32
    %c0_i32_0 = arith.constant 0 : i32
    %c0_i32_1 = arith.constant 0 : i32
    return %c0_i32, %c0_i32_0 : i32, i32
  }
  func.func @transform_2(%arg0: i32) -> (i32, i32) {
    %c0_i32 = arith.constant 0 : i32
    %c0_i32_0 = arith.constant 0 : i32
    %c0_i32_1 = arith.constant 0 : i32
    return %c0_i32, %c0_i32_0 : i32, i32
  }
  func.func @transform_3(%arg0: i32) -> (i32, i32) {
    %c0_i32 = arith.constant 0 : i32
    %c0_i32_0 = arith.constant 0 : i32
    %c0_i32_1 = arith.constant 0 : i32
    return %c0_i32, %c0_i32_0 : i32, i32
  }
  func.func @transform_4(%arg0: i32) -> (i32, i32) {
    %c0_i32 = arith.constant 0 : i32
    %c0_i32_0 = arith.constant 0 : i32
    %c0_i32_1 = arith.constant 0 : i32
    return %c0_i32, %c0_i32_0 : i32, i32
  }
  func.func @transform_5(%arg0: i32) -> (i32, i32) {
    %c0_i32 = arith.constant 0 : i32
    %c0_i32_0 = arith.constant 0 : i32
    %c0_i32_1 = arith.constant 0 : i32
    return %c0_i32, %c0_i32_0 : i32, i32
  }
  func.func @transform_6(%arg0: i32) -> (i32, i32) {
    %c0_i32 = arith.constant 0 : i32
    %c0_i32_0 = arith.constant 0 : i32
    %c0_i32_1 = arith.constant 0 : i32
    return %c0_i32, %c0_i32_0 : i32, i32
  }
  func.func @transform_7(%arg0: i32) -> (i32, i32) {
    %c0_i32 = arith.constant 0 : i32
    %c0_i32_0 = arith.constant 0 : i32
    %c0_i32_1 = arith.constant 0 : i32
    return %c0_i32, %c0_i32_0 : i32, i32
  }
  func.func @transform_8(%arg0: i32) -> (i32, i32) {
    %c0_i32 = arith.constant 0 : i32
    %c0_i32_0 = arith.constant 0 : i32
    %c0_i32_1 = arith.constant 0 : i32
    return %c0_i32, %c0_i32_0 : i32, i32
  }
  func.func @transform_9(%arg0: i32) -> (i32, i32) {
    %c0_i32 = arith.constant 0 : i32
    %c0_i32_0 = arith.constant 0 : i32
    %c0_i32_1 = arith.constant 0 : i32
    return %c0_i32, %c0_i32_0 : i32, i32
  }
  func.func @transform_10(%arg0: i32) -> (i32, i32) {
    %c0_i32 = arith.constant 0 : i32
    %c0_i32_0 = arith.constant 0 : i32
    %c0_i32_1 = arith.constant 0 : i32
    return %c0_i32, %c0_i32_0 : i32, i32
  }
  func.func @transform_11(%arg0: i32) -> (i32, i32) {
    %c0_i32 = arith.constant 0 : i32
    %c0_i32_0 = arith.constant 0 : i32
    return %arg0, %c0_i32 : i32, i32
  }
}

</mosaic_0001>

<bundles_post_ra>
// kernel: tpu_custom_call.1
= control target key start
LH: loop header
LB: loop body
LE: loop exit
PB: predicated region body
PF: predicated region fallthrough
CT: control target
= control target key end

     0   :  { %16 = vsyncpa [#allocation3], 0  ;;  %s1153_s0 = inlined_call_operand.hbm [shape: bf16[8,256], index: 0, kind: input, shape index: {}]   ;;  %s1154_s1 = inlined_call_operand.hbm [shape: bf16[128,128], index: 1, kind: input, shape index: {}]   ;;  %s1155_s2 = inlined_call_operand.hbm [shape: bf16[128,128], index: 2, kind: input, shape index: {}]   ;;  %s1156_s3 = inlined_call_operand.hbm [shape: bf16[128,128], index: 3, kind: input, shape index: {}]   ;;  %s1157_s4 = inlined_call_operand.hbm [shape: bf16[128,128], index: 4, kind: input, shape index: {}]   ;;  %s1158_s5 = inlined_call_operand.vmem [shape: f32[1,128], index: 5, kind: input, shape index: {}]   ;;  %s1159_s6 = inlined_call_operand.vmem [shape: f32[1,128], index: 6, kind: input, shape index: {}]   ;;  %s1160_s7 = inlined_call_operand.vmem [shape: f32[1,128], index: 7, kind: input, shape index: {}]   ;;  %s1161_s8 = inlined_call_operand.vmem [shape: f32[1,128], index: 8, kind: input, shape index: {}]   ;;  %s1162_s9 = inlined_call_operand.vmem [shape: f32[1,128], index: 9, kind: input, shape index: {}]   ;;  %s1163_s10 = inlined_call_operand.vmem [shape: f32[1,128], index: 10, kind: input, shape index: {}]   ;;  %s1164_s11 = inlined_call_operand.hbm [shape: f32[8,128], index: 11, kind: output, shape index: {}]  }
   0x1   :  { %17 = vsyncpa [#allocation6], 0 }
   0x2   :  { %18 = vsyncpa [#allocation9], 0 }
   0x3   :  { %19 = vsyncpa [#allocation4], 0  ;;  %s941_s17 = smov [#allocation5]   ;;  %s801_s21 = scalar_lea.hbm %s1154_s1, 1024 }
   0x4   :  { %s35_s18 = sshll.u32 %s941_s17, 4  ;;  %p802_p0 = scmp.ne.s32.totalorder %s1154_s1, %s801_s21  ;;  %s36_s18 = int_to_ptr.vmem [resolvable:$true] %s35_s18 }
   0x5   :  { %p805_p1 = scmp.lt.u32.totalorder %s801_s21, %s1154_s1 }
   0x7   :  { %p807_p2 = pnand %p805_p1, %p802_p0 }
   0x9   :  { %810 = shalt.err (!%p807_p2)
}
   0xa   :  { %s811_s26 = scalar_lea.vmem %s36_s18, 1024  ;;  %p816_p4 = scmp.lt.s32.totalorder %s36_s18, %s36_s18 }
   0xb   :  { %p812_p3 = scmp.ne.s32.totalorder %s36_s18, %s811_s26  ;;  %p817_p5 = scmp.lt.s32.totalorder %s811_s26, %s811_s26 }
   0xd   :  { %p818_p6 = por %p817_p5, %p816_p4 }
   0xf   :  { %p819_p7 = pnand %p818_p6, %p812_p3 }
  0x11   :  { %822 = shalt.err (!%p819_p7)
}
  0x12   :  { %s942_s27 = smov 64   ;;  %s943_s28 = smov 4  }
  0x13   :  { %41 = dma.hbm_to_vmem [thread:$0]  %s1154_s1, 1024, %s36_s18, [#allocation6], %s942_s27, %s942_s27, %s943_s28  }
  0x14   :  { %s944_s12 = smov [#allocation8]   ;;  %s945_s14 = smov [#allocation2]  }
  0x15   :  { %s59_s13 = sshll.u32 %s944_s12, 4  ;;  %s26_s15 = sshll.u32 %s945_s14, 4  ;;  %s60_s13 = int_to_ptr.vmem [resolvable:$true] %s59_s13  ;;  %s27_s15 = int_to_ptr.vmem [resolvable:$true] %s26_s15 }
  0x16   :  { %s823_s19 = scalar_lea.hbm %s1156_s3, 1024 }
  0x17   :  { %p824_p8 = scmp.ne.s32.totalorder %s1156_s3, %s823_s19  ;;  %p827_p9 = scmp.lt.u32.totalorder %s823_s19, %s1156_s3 }
  0x19   :  { %p829_p10 = pnand %p827_p9, %p824_p8 }
  0x1b   :  { %832 = shalt.err (!%p829_p10)
}
  0x1c   :  { %s833_s1 = scalar_lea.vmem %s60_s13, 1024  ;;  %p838_p12 = scmp.lt.s32.totalorder %s60_s13, %s60_s13 }
  0x1d   :  { %p834_p11 = scmp.ne.s32.totalorder %s60_s13, %s833_s1  ;;  %p839_p13 = scmp.lt.s32.totalorder %s833_s1, %s833_s1 }
  0x1f   :  { %p840_p0 = por %p839_p13, %p838_p12 }
  0x21   :  { %p841_p1 = pnand %p840_p0, %p834_p11 }
  0x23   :  { %844 = shalt.err (!%p841_p1)
}
  0x24   :  { %65 = dma.hbm_to_vmem [thread:$0]  %s1156_s3, 1024, %s60_s13, [#allocation9], %s942_s27, %s942_s27, %s943_s28  }
  0x25   :  { %s845_s29 = scalar_lea.hbm %s1153_s0, 128 }
  0x26   :  { %p846_p2 = scmp.ne.s32.totalorder %s1153_s0, %s845_s29  ;;  %p849_p3 = scmp.lt.u32.totalorder %s845_s29, %s1153_s0 }
  0x28   :  { %p851_p4 = pnand %p849_p3, %p846_p2 }
  0x2a   :  { %854 = shalt.err (!%p851_p4)
}
  0x2b   :  { %s855_s17 = scalar_lea.vmem %s27_s15, 128  ;;  %p860_p6 = scmp.lt.s32.totalorder %s27_s15, %s27_s15 }
  0x2c   :  { %p856_p5 = scmp.ne.s32.totalorder %s27_s15, %s855_s17  ;;  %p861_p7 = scmp.lt.s32.totalorder %s855_s17, %s855_s17 }
  0x2e   :  { %p862_p8 = por %p861_p7, %p860_p6 }
  0x30   :  { %p863_p9 = pnand %p862_p8, %p856_p5 }
  0x32   :  { %866 = shalt.err (!%p863_p9)
}
  0x33   :  { %29 = dma.hbm_to_vmem [thread:$0]  %s1153_s0, 128, %s27_s15, [#allocation3]  }
  0x34   :  { %s946_s19 = smov [#allocation7]   ;;  %s947_s21 = smov [#allocation10]  }
  0x35   :  { %s47_s20 = sshll.u32 %s946_s19, 4  ;;  %s71_s22 = sshll.u32 %s947_s21, 4  ;;  %s48_s20 = int_to_ptr.vmem [resolvable:$true] %s47_s20  ;;  %s72_s22 = int_to_ptr.vmem [resolvable:$true] %s71_s22 }
  0x36   :  { %s867_s18 = scalar_lea.hbm %s1155_s2, 1024 }
  0x37   :  { %p868_p10 = scmp.ne.s32.totalorder %s1155_s2, %s867_s18  ;;  %p871_p11 = scmp.lt.u32.totalorder %s867_s18, %s1155_s2 }
  0x39   :  { %p873_p12 = pnand %p871_p11, %p868_p10 }
  0x3b   :  { %876 = shalt.err (!%p873_p12)
}
  0x3c   :  { %s877_s0 = scalar_lea.vmem %s48_s20, 1024  ;;  %p882_p0 = scmp.lt.s32.totalorder %s48_s20, %s48_s20 }
  0x3d   :  { %p878_p13 = scmp.ne.s32.totalorder %s48_s20, %s877_s0  ;;  %p883_p1 = scmp.lt.s32.totalorder %s877_s0, %s877_s0 }
  0x3f   :  { %p884_p2 = por %p883_p1, %p882_p0 }
  0x41   :  { %p885_p3 = pnand %p884_p2, %p878_p13 }
  0x43   :  { %888 = shalt.err (!%p885_p3)
}
  0x44   :  { %53 = dma.hbm_to_vmem [thread:$0]  %s1155_s2, 1024, %s48_s20, [#allocation6], %s942_s27, %s942_s27, %s943_s28  }
  0x45   :  { %s889_s16 = scalar_lea.hbm %s1157_s4, 1024 }
  0x46   :  { %p890_p4 = scmp.ne.s32.totalorder %s1157_s4, %s889_s16  ;;  %p893_p5 = scmp.lt.u32.totalorder %s889_s16, %s1157_s4 }
  0x48   :  { %p895_p6 = pnand %p893_p5, %p890_p4 }
  0x4a   :  { %898 = shalt.err (!%p895_p6)
}
  0x4b   :  { %s899_s21 = scalar_lea.vmem %s72_s22, 1024  ;;  %p904_p8 = scmp.lt.s32.totalorder %s72_s22, %s72_s22 }
  0x4c   :  { %p900_p7 = scmp.ne.s32.totalorder %s72_s22, %s899_s21  ;;  %p905_p9 = scmp.lt.s32.totalorder %s899_s21, %s899_s21 }
  0x4e   :  { %p906_p10 = por %p905_p9, %p904_p8 }
  0x50   :  { %p907_p11 = pnand %p906_p10, %p900_p7 }
  0x52   :  { %910 = shalt.err (!%p907_p11)
}
  0x53   :  { %77 = dma.hbm_to_vmem [thread:$0]  %s1157_s4, 1024, %s72_s22, [#allocation9], %s942_s27, %s942_s27, %s943_s28  }
  0x54   :  { %933 = dma.done.wait [#allocation3], 128  }
  0x55   :  { %934 = vsyncadd [#allocation3], 4294967168 }
  0x56   :  { %935 = dma.done.wait [#allocation6], 2048  }
  0x57   :  { %936 = vsyncadd [#allocation6], 4294965248 }
  0x58   :  { %937 = dma.done.wait [#allocation9], 2048  }
  0x59   :  { %938 = vsyncadd [#allocation9], 4294965248  ;;  %v948_v0 = vmov 0.0   ;;  %vm949_vm0 = vmmov 0   ;;  %v769_v1 = vld [vmem:[#allocation5] sm:$0xff]   ;;  %v770_v2 = vld [vmem:[#allocation5 + $0x8] sm:$0xff]  }
  0x5a   :  { %675 = vmatprep.subr.bf16.mxu1 %v948_v0  ;;  %691 = vmatprep.mubr.msk.bf16.mxu1 %vm949_vm0, %v948_v0  ;;  %v771_v3 = vld [vmem:[#allocation5 + $0x10] sm:$0xff]   ;;  %v772_v4 = vld [vmem:[#allocation5 + $0x18] sm:$0xff]   ;;  %v773_v5 = vld [vmem:[#allocation5 + $0x20] sm:$0xff]   ;;  %s950_s25 = smov [#allocation11]  }
  0x5b   :  { %715 = vmatprep.subr.bf16.mxu0 %v948_v0  ;;  %731 = vmatprep.mubr.msk.bf16.mxu0 %vm949_vm0, %v948_v0  ;;  %v774_v6 = vld [vmem:[#allocation5 + $0x28] sm:$0xff]   ;;  %v775_v7 = vld [vmem:[#allocation5 + $0x30] sm:$0xff]   ;;  %v776_v8 = vld [vmem:[#allocation5 + $0x38] sm:$0xff]   ;;  %s590_s26 = sshll.u32 %s950_s25, 4  ;;  %s591_s26 = int_to_ptr.vmem [resolvable:$true] %s590_s26 }
  0x5c   :  { %676 = vmatpush3.bf16.msra.mxu1 %v769_v1  ;;  %v106_v9 = vld [vmem:[#allocation2] sm:$0xf]  ;;  %v777_v10 = vld [vmem:[#allocation7] sm:$0xff]   ;;  %v778_v11 = vld [vmem:[#allocation7 + $0x8] sm:$0xff]   ;;  %s911_s29 = scalar_lea.vmem %s591_s26, 128  ;;  %p916_p13 = scmp.lt.s32.totalorder %s591_s26, %s591_s26 }
  0x5d   :  { %677 = vmatprep.subr.bf16.mxu1 %v948_v0  ;;  %v779_v12 = vld [vmem:[#allocation7 + $0x10] sm:$0xff]   ;;  %v780_v13 = vld [vmem:[#allocation7 + $0x18] sm:$0xff]   ;;  %v781_v14 = vld [vmem:[#allocation7 + $0x20] sm:$0xff]   ;;  %p912_p12 = scmp.ne.s32.totalorder %s591_s26, %s911_s29  ;;  %p917_p0 = scmp.lt.s32.totalorder %s911_s29, %s911_s29 }
  0x5e   :  { %v782_v15 = vld [vmem:[#allocation7 + $0x28] sm:$0xff]   ;;  %v783_v16 = vld [vmem:[#allocation7 + $0x30] sm:$0xff]   ;;  %v784_v17 = vld [vmem:[#allocation7 + $0x38] sm:$0xff]  }
  0x5f   :  { %v107_v18 = vld [vmem:[#allocation2 + $0x4] sm:$0xf]  ;;  %v785_v19 = vld [vmem:[#allocation10] sm:$0xff]   ;;  %v786_v20 = vld [vmem:[#allocation10 + $0x8] sm:$0xff]   ;;  %p918_p1 = por %p917_p0, %p916_p13 }
  0x60   :  { %678 = vmatpush3.bf16.msra.mxu1 %v770_v2  ;;  %716 = vmatpush3.bf16.msra.mxu0 %v785_v19  ;;  %v787_v21 = vld [vmem:[#allocation10 + $0x10] sm:$0xff]   ;;  %v788_v22 = vld [vmem:[#allocation10 + $0x18] sm:$0xff]   ;;  %v789_v23 = vld [vmem:[#allocation10 + $0x20] sm:$0xff]  }
  0x61   :  { %679 = vmatprep.subr.bf16.mxu1 %v948_v0  ;;  %717 = vmatprep.subr.bf16.mxu0 %v948_v0  ;;  %v790_v24 = vld [vmem:[#allocation10 + $0x28] sm:$0xff]   ;;  %v791_v25 = vld [vmem:[#allocation10 + $0x30] sm:$0xff]   ;;  %v792_v26 = vld [vmem:[#allocation10 + $0x38] sm:$0xff]   ;;  %p919_p2 = pnand %p918_p1, %p912_p12 }
  0x62   :  { %v619_v32 = vld [vmem:[%s1160_s7] ss:$0 sm:$0xff]  ;;  %v793_v41 = vld [vmem:[#allocation8] sm:$0xff]   ;;  %v794_v43 = vld [vmem:[#allocation8 + $0x8] sm:$0xff]  }
  0x63   :  { %v620_v38 = vld [vmem:[%s1161_s8] ss:$0 sm:$0xff]  ;;  %v795_v44 = vld [vmem:[#allocation8 + $0x10] sm:$0xff]   ;;  %v797_v46 = vld [vmem:[#allocation8 + $0x20] sm:$0xff]  }
  0x64   :  { %680 = vmatpush3.bf16.msra.mxu1 %v771_v3  ;;  %718 = vmatpush3.bf16.msra.mxu0 %v786_v20  ;;  %v796_v45 = vld [vmem:[#allocation8 + $0x18] sm:$0xff]   ;;  %v798_v48 = vld [vmem:[#allocation8 + $0x28] sm:$0xff]   ;;  %v799_v51 = vld [vmem:[#allocation8 + $0x30] sm:$0xff]  }
  0x65   :  { %681 = vmatprep.subr.bf16.mxu1 %v948_v0  ;;  %719 = vmatprep.subr.bf16.mxu0 %v948_v0  ;;  %v609_v49 = vld [vmem:[%s1158_s5] ss:$0 sm:$0xff] }
  0x66   :  { %v610_v53 = vld [vmem:[%s1159_s6] ss:$0 sm:$0xff] }
  0x67   :  { %v800_v54 = vld [vmem:[#allocation8 + $0x38] sm:$0xff]  }
  0x68   :  { %682 = vmatpush3.bf16.msra.mxu1 %v772_v4  ;;  %720 = vmatpush3.bf16.msra.mxu0 %v787_v21  ;;  %v637_v58 = vld [vmem:[%s1162_s9] ss:$0 sm:$0xff] }
  0x69   :  { %683 = vmatprep.subr.bf16.mxu1 %v948_v0  ;;  %721 = vmatprep.subr.bf16.mxu0 %v948_v0  ;;  %v638_v1 = vld [vmem:[%s1163_s10] ss:$0 sm:$0xff] }
  0x6c   :  { %684 = vmatpush3.bf16.msra.mxu1 %v773_v5  ;;  %722 = vmatpush3.bf16.msra.mxu0 %v788_v22 }
  0x6d   :  { %685 = vmatprep.subr.bf16.mxu1 %v948_v0  ;;  %723 = vmatprep.subr.bf16.mxu0 %v948_v0 }
  0x70   :  { %686 = vmatpush3.bf16.msra.mxu1 %v774_v6  ;;  %724 = vmatpush3.bf16.msra.mxu0 %v789_v23 }
  0x71   :  { %687 = vmatprep.subr.bf16.mxu1 %v948_v0  ;;  %725 = vmatprep.subr.bf16.mxu0 %v948_v0 }
  0x74   :  { %688 = vmatpush3.bf16.msra.mxu1 %v775_v7  ;;  %726 = vmatpush3.bf16.msra.mxu0 %v790_v24 }
  0x75   :  { %689 = vmatprep.subr.bf16.mxu1 %v948_v0  ;;  %727 = vmatprep.subr.bf16.mxu0 %v948_v0 }
  0x78   :  { %690 = vmatpush3.bf16.msra.mxu1 %v776_v8  ;;  %728 = vmatpush3.bf16.msra.mxu0 %v791_v25 }
  0x79   :  { %695 = vmatprep.subr.bf16.mxu1 %v948_v0  ;;  %729 = vmatprep.subr.bf16.mxu0 %v948_v0 }
  0x7b   :  { %692 = vmatmul.mubr.bf16.vlgmr.msra.gmra.mrb[0].mxu1 %v106_v9 }
  0x7c   :  { %696 = vmatpush3.bf16.msra.mxu1 %v777_v10  ;;  %711 = vmatprep.mubr.msk.bf16.mxu1 %vm949_vm0, %v948_v0 }
  0x7d   :  { %697 = vmatprep.subr.bf16.mxu1 %v948_v0  ;;  %730 = vmatpush3.bf16.msra.mxu0 %v792_v26 }
  0x7e   :  { %735 = vmatprep.subr.bf16.mxu0 %v948_v0 }
  0x80   :  { %698 = vmatpush3.bf16.msra.mxu1 %v778_v11 }
  0x81   :  { %699 = vmatprep.subr.bf16.mxu1 %v948_v0 }
  0x84   :  { %700 = vmatpush3.bf16.msra.mxu1 %v779_v12 }
  0x85   :  { %701 = vmatprep.subr.bf16.mxu1 %v948_v0 }
  0x88   :  { %702 = vmatpush3.bf16.msra.mxu1 %v780_v13 }
  0x89   :  { %703 = vmatprep.subr.bf16.mxu1 %v948_v0 }
  0x8c   :  { %704 = vmatpush3.bf16.msra.mxu1 %v781_v14 }
  0x8d   :  { %705 = vmatprep.subr.bf16.mxu1 %v948_v0 }
  0x90   :  { %706 = vmatpush3.bf16.msra.mxu1 %v782_v15 }
  0x91   :  { %707 = vmatprep.subr.bf16.mxu1 %v948_v0 }
  0x94   :  { %708 = vmatpush3.bf16.msra.mxu1 %v783_v16 }
  0x95   :  { %709 = vmatprep.subr.bf16.mxu1 %v948_v0 }
  0x98   :  { %710 = vmatpush3.bf16.msra.mxu1 %v784_v17 }
  0x9b   :  { %712 = vmatmul.mubr.bf16.vlgmr.msra.gmra.mrb[4].mxu1 %v107_v18 }
 0x14e   :  { %v212_v27 = vpop.f32.mrb[0].mxu1 }
 0x14f   :  { %v693_v28 = vpop.f32.mrb[1].mxu1  ;;  %v219_v47 = vmul.f32 0.01, %v212_v27  ;;  %vm218_vm2 = vcmp.ge.f32.partialorder %v212_v27, 0.0 }
 0x150   :  { %v215_v29 = vpop.f32.mrb[2].mxu1 }
 0x151   :  { %v694_v30 = vpop.f32.mrb[3].mxu1  ;;  %v220_v50 = vsel %vm218_vm2, %v212_v27, %v219_v47 }
 0x152   :  { %v227_v52 = vmul.f32 %v609_v49, %v220_v50 }
 0x154   :  { %v234_v55 = vadd.f32 %v610_v53, %v227_v52 }
 0x156   :  { %v356_v56 = vpack.c.bf16 %v234_v55, %v234_v55 }
 0x16e   :  { %v333_v31 = vpop.f32.mrb[4].mxu1 }
 0x16f   :  { %vm339_vm1 = vcmp.ge.f32.partialorder %v333_v31, 0.0  ;;  %v340_v33 = vmul.f32 0.01, %v333_v31  ;;  %v713_v34 = vpop.f32.mrb[5].mxu1 }
 0x170   :  { %v336_v35 = vpop.f32.mrb[6].mxu1 }
 0x171   :  { %v341_v36 = vsel %vm339_vm1, %v333_v31, %v340_v33  ;;  %v714_v37 = vpop.f32.mrb[7].mxu1 }
 0x172   :  { %v348_v39 = vmul.f32 %v619_v32, %v341_v36 }
 0x174   :  { %v355_v40 = vadd.f32 %v620_v38, %v348_v39 }
 0x176   :  { %v373_v42 = vpack.c.bf16 %v355_v40, %v355_v40 }
 0x178   :  { %732 = vmatmul.mubr.bf16.vlgmr.msra.gmra.mrb[0].mxu0 %v373_v42 }
 0x179   :  { %736 = vmatpush3.bf16.msra.mxu0 %v793_v41  ;;  %751 = vmatprep.mubr.msk.bf16.mxu0 %vm949_vm0, %v948_v0 }
 0x17a   :  { %737 = vmatprep.subr.bf16.mxu0 %v948_v0 }
 0x17d   :  { %738 = vmatpush3.bf16.msra.mxu0 %v794_v43 }
 0x17e   :  { %739 = vmatprep.subr.bf16.mxu0 %v948_v0 }
 0x181   :  { %740 = vmatpush3.bf16.msra.mxu0 %v795_v44 }
 0x182   :  { %741 = vmatprep.subr.bf16.mxu0 %v948_v0 }
 0x185   :  { %742 = vmatpush3.bf16.msra.mxu0 %v796_v45 }
 0x186   :  { %743 = vmatprep.subr.bf16.mxu0 %v948_v0 }
 0x189   :  { %744 = vmatpush3.bf16.msra.mxu0 %v797_v46 }
 0x18a   :  { %745 = vmatprep.subr.bf16.mxu0 %v948_v0 }
 0x18d   :  { %746 = vmatpush3.bf16.msra.mxu0 %v798_v48 }
 0x18e   :  { %747 = vmatprep.subr.bf16.mxu0 %v948_v0 }
 0x191   :  { %748 = vmatpush3.bf16.msra.mxu0 %v799_v51 }
 0x192   :  { %749 = vmatprep.subr.bf16.mxu0 %v948_v0 }
 0x195   :  { %750 = vmatpush3.bf16.msra.mxu0 %v800_v54 }
 0x198   :  { %752 = vmatmul.mubr.bf16.vlgmr.msra.gmra.mrb[0].mxu0 %v356_v56 }
 0x26b   :  { %v560_v57 = vpop.f32.mrb[0].mxu0 }
 0x26c   :  { %vm566_vm3 = vcmp.ge.f32.partialorder %v560_v57, 0.0  ;;  %v567_v59 = vmul.f32 0.01, %v560_v57  ;;  %v753_v60 = vpop.f32.mrb[1].mxu0 }
 0x26d   :  { %v563_v61 = vpop.f32.mrb[2].mxu0 }
 0x26e   :  { %v568_v62 = vsel %vm566_vm3, %v560_v57, %v567_v59  ;;  %v754_v63 = vpop.f32.mrb[3].mxu0 }
 0x26f   :  { %v575_v0 = vmul.f32 %v637_v58, %v568_v62 }
 0x271   :  { %v582_v2 = vadd.f32 %v638_v1, %v575_v0 }
 0x273   :  { %583 = vst [vmem:[#allocation11] sm:$0xff] %v582_v2 }
 0x274   :  { %922 = shalt.err (!%p919_p2)
}
 0x275   :  { %s923_s15 = scalar_lea.hbm %s1164_s11, 128 }
 0x276   :  { %p924_p3 = scmp.ne.s32.totalorder %s1164_s11, %s923_s15  ;;  %p927_p4 = scmp.lt.u32.totalorder %s923_s15, %s1164_s11 }
 0x278   :  { %p929_p5 = pnand %p927_p4, %p924_p3 }
 0x27a   :  { %932 = shalt.err (!%p929_p5)
}
 0x27b   :  { %593 = dma.vmem_to_hbm [thread:$0]  %s591_s26, 128, %s1164_s11, [#allocation4]  }
 0x27c   :  { %939 = dma.done.wait [#allocation4], 128  }
 0x27d   :  { %940 = vsyncadd [#allocation4], 4294967168 }
 0x27e   :  { %597 = vsyncpa [#allocation3], 1 }
 0x27f   :  { %598 = vsyncpa [#allocation6], 1 }
 0x280   :  { %599 = vsyncpa [#allocation9], 1 }
 0x281   :  { %600 = vsyncpa [#allocation4], 1 }

</bundles_post_ra>
